<compile_context>
chip_gen: v5e
topology: v5e:2x2
jax: 0.10.0
libtpu: 0.0.40
codegen_flags: <defaults>
</compile_context>

<pallas_src>
import jax
import jax.numpy as jnp
from jax.experimental import pallas as pl
from jax.experimental.pallas import tpu as pltpu


def _pick_l_tile(L):
    """Lane tile for the output length."""
    # Keep the whole length while it is small (single grid step along L);
    # otherwise use lane-aligned tiles so output stores stay unmasked, VMEM per
    # grid step stays bounded (v7x has only 64 MiB), and the grid has enough
    # steps to pipeline the output writeback.
    if L <= 2048 or L % 128 != 0:
        return L
    for tl in (2048, 1024, 512, 256, 128):
        if L % tl == 0:
            return tl
    return L


def _make_fused_kernel(C_out, C_in, K, L, TL, has_bias, compute_dtype):
    """Circular wrap handled in-kernel; one stacked matmul per output tile."""
    left = K // 2
    n_l = L // TL

    def body(x_ref, w_ref, b_ref, o_ref, xs_ref):
        # Build the (K*C_in, L) stack of circularly shifted copies ONCE per
        # batch row (first L-tile); later tiles of the same row reuse it from
        # the VMEM scratch instead of re-running the XLU rolls.
        @pl.when(pl.program_id(1) == 0)
        def _():
            x = x_ref[0]                                    # (C_in, L)
            for t in range(K):
                s = (left - t) % L
                xs_ref[t * C_in:(t + 1) * C_in, :] = (
                    pltpu.roll(x, s, 1) if s else x)

        if n_l > 1:
            off = pl.multiple_of(pl.program_id(1) * TL, 128)
            xs = xs_ref[:, pl.ds(off, TL)]                  # lane-aligned slice
        else:
            xs = xs_ref[...]
        # Whole conv = ONE matmul with contraction K*C_in (feeds the MXU far
        # better than K tiny matmuls).
        acc = jnp.dot(w_ref[...], xs.astype(compute_dtype),
                      preferred_element_type=jnp.float32)
        if has_bias:
            acc = acc + b_ref[...]                          # bias folded in-kernel
        o_ref[0] = acc.astype(o_ref.dtype)

    if has_bias:
        def kernel(x_ref, w_ref, b_ref, o_ref, xs_ref):
            body(x_ref, w_ref, b_ref, o_ref, xs_ref)
    else:
        def kernel(x_ref, w_ref, o_ref, xs_ref):
            body(x_ref, w_ref, None, o_ref, xs_ref)
    return kernel


def _make_safe_kernel(C_out, C_in, K, L, TL, has_bias, compute_dtype):
    """Layout-safe path: circularly padded x, K per-tap matmuls."""
    n_l = L // TL

    def body(x_ref, w_ref, b_ref, o_ref):
        x = x_ref[0]                                        # (C_in, L + K - 1)
        acc = jnp.zeros((C_out, TL), jnp.float32)
        for t in range(K):
            if n_l > 1:
                base = pl.multiple_of(pl.program_id(1) * TL, 128)
                win = jax.lax.dynamic_slice_in_dim(x, base + t, TL, axis=1)
            else:
                win = x[:, t:t + TL]
            # Weight is lane-dense (K, C_out, C_in): tap read is a free
            # leading-axis index.
            acc = acc + jnp.dot(w_ref[t], win.astype(compute_dtype),
                                preferred_element_type=jnp.float32)
        if has_bias:
            acc = acc + b_ref[...]
        o_ref[0] = acc.astype(o_ref.dtype)

    if has_bias:
        def kernel(x_ref, w_ref, b_ref, o_ref):
            body(x_ref, w_ref, b_ref, o_ref)
    else:
        def kernel(x_ref, w_ref, o_ref):
            body(x_ref, w_ref, None, o_ref)
    return kernel


def bjorck_conv1d_forward(x, weight, bias=None, *, compute_in_bf16=False,
                          l_tile=None):
    """out = F.conv1d(circular_pad(x, (K//2, (K-1)//2)), weight, bias)."""
    B, C_in, L = x.shape
    C_out, C_in_w, K = weight.shape
    assert C_in == C_in_w
    left, right = K // 2, (K - 1) // 2
    has_bias = bias is not None
    compute_dtype = jnp.bfloat16 if compute_in_bf16 else jnp.float32

    if l_tile is not None and L % l_tile == 0 and l_tile % 128 == 0:
        TL = l_tile
    else:
        TL = _pick_l_tile(L)
    n_l = L // TL

    # Aligned shapes take the fused (roll + stacked single-matmul) path; small
    # or unaligned shapes take the layout-safe padded path.
    fused = (L % 128 == 0) and (C_in % 8 == 0) and \
        (x.dtype == jnp.float32 or x.dtype == jnp.bfloat16)

    scratch_shapes = []
    if fused:
        # No padded copy of x in HBM: the circular wrap is handled in-kernel.
        x_in = x
        x_spec = pl.BlockSpec((1, C_in, L), lambda b, j: (b, 0, 0))
        # Lane-dense stacked weight (C_out, K*C_in); constant index map keeps
        # it (and the bias) VMEM-resident across all grid steps.  Pre-cast to
        # the compute dtype so there is no per-step cast in the kernel.
        w_in = (jnp.transpose(weight, (0, 2, 1))
                .reshape(C_out, K * C_in).astype(compute_dtype))
        w_spec = pl.BlockSpec((C_out, K * C_in), lambda b, j: (0, 0))
        scratch_shapes = [pltpu.VMEM((K * C_in, L), x.dtype)]
        kernel = _make_fused_kernel(C_out, C_in, K, L, TL, has_bias,
                                    compute_dtype)
        # Second axis carries the per-row scratch -> must stay on one core.
        dims = ("parallel", "arbitrary")
    else:
        assert K - 1 <= L, "circular padding requires kernel_size - 1 <= length"
        parts = []
        if left:
            parts.append(x[..., L - left:])
        parts.append(x)
        if right:
            parts.append(x[..., :right])
        x_in = jnp.concatenate(parts, axis=-1)              # (B, C_in, L+K-1)
        x_spec = pl.BlockSpec((1, C_in, L + K - 1), lambda b, j: (b, 0, 0))
        # Lane-dense weight (K, C_out, C_in): avoids the ~40x VMEM inflation of
        # a (C_out, C_in, K) layout whose K-lane minor dim pads up to 128.
        w_in = jnp.transpose(weight, (2, 0, 1)).astype(compute_dtype)
        w_spec = pl.BlockSpec((K, C_out, C_in), lambda b, j: (0, 0, 0))
        kernel = _make_safe_kernel(C_out, C_in, K, L, TL, has_bias,
                                   compute_dtype)
        dims = ("parallel", "parallel")

    in_specs = [x_spec, w_spec]
    inputs = [x_in, w_in]
    if has_bias:
        in_specs.append(pl.BlockSpec((C_out, 1), lambda b, j: (0, 0)))
        inputs.append(jnp.asarray(bias, jnp.float32).reshape(C_out, 1))

    return pl.pallas_call(
        kernel,
        out_shape=jax.ShapeDtypeStruct((B, C_out, L), x.dtype),
        grid_spec=pltpu.PrefetchScalarGridSpec(
            num_scalar_prefetch=0,
            grid=(B, n_l),
            in_specs=in_specs,
            out_specs=pl.BlockSpec((1, C_out, TL), lambda b, j: (b, 0, j)),
            scratch_shapes=scratch_shapes,
        ),
        compiler_params=pltpu.CompilerParams(dimension_semantics=dims),
    )(*inputs)


def init_permutation_weight(key, in_channels, out_channels, kernel_size):
    """'permutation' init of the module: a permutation matrix at the center tap
    (the Björck projection is a fixed point for this weight)."""
    max_c = max(in_channels, out_channels)
    min_c = min(in_channels, out_channels)
    perm = jax.random.permutation(key, max_c)[:min_c]
    matrix = jnp.zeros((out_channels, in_channels), jnp.float32)
    if out_channels < in_channels:
        matrix = matrix.at[jnp.arange(min_c), perm].set(1.0)
    else:
        matrix = matrix.at[perm, jnp.arange(min_c)].set(1.0)
    w = jnp.zeros((out_channels, in_channels, kernel_size), jnp.float32)
    w = w.at[:, :, kernel_size // 2].set(matrix)
    return w


def _reference_forward(x, w, b=None):
    """Pure-VPU (no-matmul) reference for the circular conv1d, exact in f32."""
    K = w.shape[-1]
    left = K // 2
    out = jnp.zeros((x.shape[0], w.shape[0], x.shape[-1]), jnp.float32)
    for t in range(K):
        xr = jnp.roll(x, left - t, axis=-1)
        out = out + (w[None, :, :, t, None] * xr[:, None, :, :]).sum(axis=2)
    if b is not None:
        out = out + b[None, :, None]
    return out


if __name__ == "__main__":
    key = jax.random.PRNGKey(0)
    kx, kw_perm, kw_rand, kb, kx2, kw2, kb2 = jax.random.split(key, 7)

    # 1) Module-default configuration at small/unaligned shapes (layout-safe
    #    path): permutation init, bias=False.
    B, C_in, C_out, L, K = 2, 4, 4, 16, 3
    x = jax.random.normal(kx, (B, C_in, L), dtype=jnp.float32)
    w_perm = init_permutation_weight(kw_perm, C_in, C_out, K)
    out1 = jax.block_until_ready(bjorck_conv1d_forward(x, w_perm))
    assert out1.shape == (B, C_out, L), out1.shape
    assert jnp.allclose(out1, _reference_forward(x, w_perm), atol=1e-5), \
        "mismatch vs reference (permutation weight)"

    # 2) Arbitrary weights + bias (exercises the in-kernel bias epilogue).
    w_rand = jax.random.normal(kw_rand, (C_out, C_in, K), dtype=jnp.float32)
    bias = jax.random.normal(kb, (C_out,), dtype=jnp.float32)
    out2 = jax.block_until_ready(bjorck_conv1d_forward(x, w_rand, bias))
    assert jnp.allclose(out2, _reference_forward(x, w_rand, bias),
                        atol=1e-3, rtol=1e-3), \
        "mismatch vs reference (random weight + bias)"

    # 3) Lane-aligned shapes -> fused (in-kernel circular roll) path, even K.
    B2, C2i, C2o, L2, K2 = 2, 8, 8, 256, 4
    x2 = jax.random.normal(kx2, (B2, C2i, L2), dtype=jnp.float32)
    w2 = jax.random.normal(kw2, (C2o, C2i, K2), dtype=jnp.float32)
    b2 = jax.random.normal(kb2, (C2o,), dtype=jnp.float32)
    out3 = jax.block_until_ready(bjorck_conv1d_forward(x2, w2, b2))
    assert jnp.allclose(out3, _reference_forward(x2, w2, b2),
                        atol=1e-3, rtol=1e-3), \
        "mismatch vs reference (fused path)"

    # 4) Same data, but force L-tiling (TL=128, 2 tiles per row) to exercise
    #    the roll-once-per-row scratch + tiled lane-dense output path.
    out4 = jax.block_until_ready(bjorck_conv1d_forward(x2, w2, b2, l_tile=128))
    assert jnp.allclose(out4, out3, atol=1e-5), \
        "mismatch between tiled and untiled fused paths"

    print("KERNEL_OK")
</pallas_src>

<mosaic_0001>
module attributes {stable_mosaic.version = 11 : i64} {
  func.func @kernel(%arg0: i32, %arg1: i32, %arg2: memref<1x4x18xf32, #tpu.memory_space<vmem>>, %arg3: memref<3x4x4xf32, #tpu.memory_space<vmem>>, %arg4: memref<1x4x16xf32, #tpu.memory_space<vmem>>) attributes {dimension_semantics = [#tpu.dimension_semantics<parallel>, #tpu.dimension_semantics<parallel>], iteration_bounds = array<i64: 2, 1>, scalar_prefetch = 0 : i64, scratch_operands = 0 : i64, tpu.core_type = #tpu.core_type<tc>, window_params = [{transform_indices = @transform_0, window_bounds = array<i64: 1, 4, 18>}, {pipeline_mode = #tpu.pipeline_mode<synchronous>, transform_indices = @transform_1, window_bounds = array<i64: 3, 4, 4>}, {transform_indices = @transform_2, window_bounds = array<i64: 1, 4, 16>}]} {
    %c0 = arith.constant 0 : index
    %c0_0 = arith.constant 0 : index
    %c0_1 = arith.constant 0 : index
    %0 = vector.load %arg2[%c0, %c0_0, %c0_1] : memref<1x4x18xf32, #tpu.memory_space<vmem>>, vector<1x4x18xf32>
    %1 = vector.shape_cast %0 : vector<1x4x18xf32> to vector<4x18xf32>
    %cst = arith.constant 0.000000e+00 : f32
    %2 = vector.broadcast %cst : f32 to vector<4x16xf32>
    %3 = vector.extract_strided_slice %1 {offsets = [0, 0], sizes = [4, 16], strides = [1, 1]} : vector<4x18xf32> to vector<4x16xf32>
    %c0_2 = arith.constant 0 : index
    %c0_3 = arith.constant 0 : index
    %c0_4 = arith.constant 0 : index
    %4 = vector.load %arg3[%c0_2, %c0_3, %c0_4] : memref<3x4x4xf32, #tpu.memory_space<vmem>>, vector<1x4x4xf32>
    %5 = vector.shape_cast %4 : vector<1x4x4xf32> to vector<4x4xf32>
    %cst_5 = arith.constant dense<0.000000e+00> : vector<4x16xf32>
    %6 = tpu.matmul %5, %3, %cst_5 {dimension_numbers = #tpu.dot_dimension_numbers<[1], [0], [0], [1], [0, 0, 1, 1], [], []>} : vector<4x4xf32>, vector<4x16xf32>, vector<4x16xf32> -> vector<4x16xf32>
    %7 = arith.addf %2, %6 : vector<4x16xf32>
    %8 = vector.extract_strided_slice %1 {offsets = [0, 1], sizes = [4, 16], strides = [1, 1]} : vector<4x18xf32> to vector<4x16xf32>
    %c1 = arith.constant 1 : index
    %c0_6 = arith.constant 0 : index
    %c0_7 = arith.constant 0 : index
    %9 = vector.load %arg3[%c1, %c0_6, %c0_7] : memref<3x4x4xf32, #tpu.memory_space<vmem>>, vector<1x4x4xf32>
    %10 = vector.shape_cast %9 : vector<1x4x4xf32> to vector<4x4xf32>
    %cst_8 = arith.constant dense<0.000000e+00> : vector<4x16xf32>
    %11 = tpu.matmul %10, %8, %cst_8 {dimension_numbers = #tpu.dot_dimension_numbers<[1], [0], [0], [1], [0, 0, 1, 1], [], []>} : vector<4x4xf32>, vector<4x16xf32>, vector<4x16xf32> -> vector<4x16xf32>
    %12 = arith.addf %7, %11 : vector<4x16xf32>
    %13 = vector.extract_strided_slice %1 {offsets = [0, 2], sizes = [4, 16], strides = [1, 1]} : vector<4x18xf32> to vector<4x16xf32>
    %c2 = arith.constant 2 : index
    %c0_9 = arith.constant 0 : index
    %c0_10 = arith.constant 0 : index
    %14 = vector.load %arg3[%c2, %c0_9, %c0_10] : memref<3x4x4xf32, #tpu.memory_space<vmem>>, vector<1x4x4xf32>
    %15 = vector.shape_cast %14 : vector<1x4x4xf32> to vector<4x4xf32>
    %cst_11 = arith.constant dense<0.000000e+00> : vector<4x16xf32>
    %16 = tpu.matmul %15, %13, %cst_11 {dimension_numbers = #tpu.dot_dimension_numbers<[1], [0], [0], [1], [0, 0, 1, 1], [], []>} : vector<4x4xf32>, vector<4x16xf32>, vector<4x16xf32> -> vector<4x16xf32>
    %17 = arith.addf %12, %16 : vector<4x16xf32>
    %c0_12 = arith.constant 0 : index
    %c0_13 = arith.constant 0 : index
    %c0_14 = arith.constant 0 : index
    %18 = vector.load %arg4[%c0_12, %c0_13, %c0_14] : memref<1x4x16xf32, #tpu.memory_space<vmem>>, vector<1x4x16xf32>
    %19 = vector.shape_cast %18 : vector<1x4x16xf32> to vector<4x16xf32>
    %20 = vector.shape_cast %17 : vector<4x16xf32> to vector<1x4x16xf32>
    tpu.vector_store %arg4[%c0_12, %c0_13, %c0_14], %20 {strides = array<i32>} : memref<1x4x16xf32, #tpu.memory_space<vmem>>, vector<1x4x16xf32>,
    return
  }
  func.func @transform_0(%arg0: i32, %arg1: i32) -> (i32, i32, i32) {
    %c0_i32 = arith.constant 0 : i32
    %c0_i32_0 = arith.constant 0 : i32
    %c0_i32_1 = arith.constant 0 : i32
    return %arg0, %c0_i32, %c0_i32_0 : i32, i32, i32
  }
  func.func @transform_1(%arg0: i32, %arg1: i32) -> (i32, i32, i32) {
    %c0_i32 = arith.constant 0 : i32
    %c0_i32_0 = arith.constant 0 : i32
    %c0_i32_1 = arith.constant 0 : i32
    %c0_i32_2 = arith.constant 0 : i32
    return %c0_i32, %c0_i32_0, %c0_i32_1 : i32, i32, i32
  }
  func.func @transform_2(%arg0: i32, %arg1: i32) -> (i32, i32, i32) {
    %c0_i32 = arith.constant 0 : i32
    %c0_i32_0 = arith.constant 0 : i32
    return %arg0, %c0_i32, %arg1 : i32, i32, i32
  }
}

</mosaic_0001>

<bundles_post_ra>
// kernel: tpu_custom_call.1
= control target key start
LH: loop header
LB: loop body
LE: loop exit
PB: predicated region body
PF: predicated region fallthrough
CT: control target
= control target key end

     0   :  { %7 = vsyncpa [#allocation3], 0  ;;  %s798_s0 = inlined_call_operand.hbm [shape: f32[2,4,18], index: 0, kind: input, shape index: {}]   ;;  %s799_s1 = inlined_call_operand.hbm [shape: f32[3,4,4], index: 1, kind: input, shape index: {}]   ;;  %s800_s2 = inlined_call_operand.hbm [shape: f32[2,4,16], index: 2, kind: output, shape index: {}]  }
   0x1   :  { %9 = vsyncpa [#allocation3 + $0x1], 0 }
   0x2   :  { %10 = vsyncpa [#allocation6], 0 }
   0x3   :  { %11 = vsyncpa [#allocation4], 0 }
   0x4   :  { %13 = vsyncpa [#allocation4 + $0x1], 0  ;;  %s655_s9 = smov 0   ;;  %s657_s10 = smov 0  }
   0x5   :  { %s659_s11 = smov 0   ;;  %s661_s12 = smov 0  }
   0x6   :  { %s663_s13 = smov 0   ;;  %s665_s14 = smov 0  }
   0x7 LB: > { %s389_s15 = sadd.s32 4294967295, %s633_s14   ;;  %p391_p0 = scmp.ge.s32.totalorder %s633_s14, 1  ;;  %s633_s14 = sphi %s665_s14, %s19_s14   ;;  %s629_s13 = sphi %s663_s13, %s811_s13   ;;  %s625_s12 = sphi %s661_s12, %s810_s12   ;;  %s621_s11 = sphi %s659_s11, %s809_s11   ;;  %s617_s10 = sphi %s657_s10, %s808_s10   ;;  %s613_s9 = sphi %s655_s9, %s807_s9  }
   0x8   : > { %p687_p1 = scmp.eq.s32.totalorder %s389_s15, 0  ;;  %p111_p2 = scmp.lt.s32.totalorder %s633_s14, 3 }
   0x9   : > { %s122_s19 = sshll.u32 %s799_s1, 4  ;;  %s635_s21 = smov [#allocation5]   ;;  %s123_s19 = int_to_ptr.hbm [resolvable:$true] %s122_s19 }
   0xa   : > { %p695_p3 = pnand %p391_p0, %p111_p2  ;;  %s124_s22 = sshll.u32 %s635_s21, 4  ;;  %s125_s22 = int_to_ptr.vmem [resolvable:$true] %s124_s22 }
   0xb   : > { %p393_p6 = scmp.ge.s32.totalorder %s633_s14, 2  ;;  %s636_s23 = smov 64  }
   0xc   : > { %p418_p4 = pneg %p695_p3  ;;  %s637_s24 = smov 4  }
   0xd   : > { %s390_s25 = sadd.s32 4294967294, %s633_s14   ;;  %s31_s26 = sadd.s32 1, %s629_s13 }
   0xe   : > { %p419_p5 = pnand %p418_p4, %p687_p1  ;;  %s38_s27 = sadd.s32 1, %s621_s11 }
   0xf   : > { %p33_p7 = scmp.ge.s32.totalorder %s31_s26, 2  ;;  %p45_p8 = scmp.ne.s32.totalorder %s621_s11, %s617_s10 }
  0x10   : > { %421 = dma.hbm_to_vmem [thread:$0]  (!%p419_p5), %s123_s19, 192, %s125_s22, [#allocation6], %s636_s23, %s636_s23, %s637_s24  }
  0x11   : > { %p46_p9 = scmp.eq.s32.totalorder %s633_s14, 0  ;;  %p51_p10 = scmp.ne.s32.totalorder %s617_s10, %s613_s9 }
  0x12   : > { %s813_s26 = smov (%p33_p7, %s31_s26), 0  ;;  %p98_p13 = scmp.eq.s32.totalorder %s389_s15, 1 }
  0x13   : > { %p714_p11 = por %p46_p9, %p45_p8  ;;  %p720_p12 = por %p687_p1, %p51_p10 }
  0x14   : > { %s35_s30 = ssub.s32 %s629_s13, %s813_s26  ;;  %p104_p2 = scmp.eq.s32.totalorder %s390_s25, 1 }
  0x15   : > { %p36_p0 = scmp.eq.s32.totalorder %s35_s30, 0  ;;  %p726_p4 = por %p98_p13, %p45_p8 }
  0x16   : > { %p431_p5 = scmp.lt.s32.totalorder %s633_s14, 2  ;;  %p734_p7 = por %p104_p2, %p51_p10 }
  0x17   : > { %s732_s4 = scalar_select %p36_p0, %s621_s11, %s38_s27  }
  0x18   : > { %s138_s6 = sand.u32 1, %s621_s11   ;;  %s395_s8 = sshll.u32 %s629_s13, 2 }
  0x19   : > { %s394_s7 = sshll.u32 %s138_s6, 2  ;;  %s146_s15 = scalar_lea.hbm %s798_s0, %s395_s8 }
  0x1a   : > { %s142_s19 = scalar_lea.vmem [#allocation2], %s394_s7  ;;  %s148_s22 = sshll.u32 %s146_s15, 4  ;;  %s149_s22 = int_to_ptr.hbm [resolvable:$true] %s148_s22 }
  0x1b   : > { %s150_s21 = sshll.u32 %s142_s19, 4  ;;  %p423_p8 = pnand %p431_p5, %p714_p11  ;;  %s151_s21 = int_to_ptr.vmem [resolvable:$true] %s150_s21 }
  0x1c   : > { %s139_s23 = scalar_lea.sflag [#allocation3], %s138_s6  ;;  %159 = sbr.rel (%p695_p3) target bundleno = 294 (0x126), region = 28 }
  0x1d   : > { %425 = dma.hbm_to_vmem [thread:$0]  (!%p423_p8), %s149_s22, 64, %s151_s21, %s139_s23  }
  0x1e   : > { %s748_s24 = sand.u32 (!%p695_p3), 1, %s617_s10  }
  0x1f   : > { %s397_s25 = sshll.u32 (!%p695_p3), %s748_s24, 2  ;;  %s162_s27 = scalar_lea.sflag (!%p695_p3), [#allocation3], %s748_s24 }
  0x20   : > { %s165_s30 = scalar_lea.vmem (!%p695_p3), [#allocation2], %s397_s25 }
  0x21   : > { %600 = dma.done.wait (%p720_p12), %s162_s27, 64  }
  0x22   : > { %602 = vsyncadd (%p720_p12), %s162_s27, 4294967232 }
  0x23   : > { %604 = dma.done.wait (%p687_p1), [#allocation6], 192  }
  0x24   : > { %606 = vsyncadd (%p687_p1), [#allocation6], 4294967104  ;;  %v192_v0 = vld [vmem:[%s165_s30] sm:$0xf]  ;;  %s638_s20 = smov 126   ;;  %s639_s28 = smov 127  }
  0x25   : > { %253 = vrot.lane.b32.xlu0 %v192_v0, %s638_s20  ;;  %vm203_vm0 = vcmask 1043456   ;;  %vm199_vm1 = vcmask 31744   ;;  %v193_v1 = vld [vmem:[#allocation5] sm:$0xf]  ;;  %v252_v2 = vld [vmem:[#allocation5 + $0x8] sm:$0xf] }
  0x26   : > { %402 = vmatpush.msk.msra.mxu1 %vm203_vm0, %v192_v0  ;;  %v195_v4 = vld [vmem:[#allocation5 + $0x4] sm:$0xf]  ;;  %s407_s16 = sshll.u32 %s625_s12, 2  ;;  %s191_s8 = scalar_lea.vmem [#allocation7], %s397_s25  ;;  %vm281_vm2 = vcmask 125952  }
  0x27   : > { %403 = vmatmul.msk.f32.vlgmr.msra.gmra.mxu1 %vm199_vm1, %v193_v1  ;;  %s295_s7 = scalar_lea.hbm %s800_s2, %s407_s16  ;;  %s297_s17 = sshll.u32 %s191_s8, 4  ;;  %s298_s17 = int_to_ptr.vmem [resolvable:$true] %s297_s17 }
  0x28   : > { %s299_s18 = sshll.u32 %s295_s7, 4  ;;  %s284_s15 = scalar_lea.sflag [#allocation4], %s748_s24  ;;  %s300_s18 = int_to_ptr.hbm [resolvable:$true] %s299_s18 }
  0x29   : > { %s561_s19 = sshra.s32 %s300_s18, 4  ;;  %s567_s23 = scalar_lea.hbm %s800_s2, 8  ;;  %s562_s19 = int_to_ptr.hbm [resolvable:$true] %s561_s19 }
  0x2a   : > { %s563_s12 = scalar_lea.hbm %s562_s19, 4  ;;  %p568_p10 = scmp.lt.s32.totalorder %s562_s19, %s800_s2 }
  0x2b   : > { %p564_p1 = scmp.ne.s32.totalorder %s562_s19, %s563_s12  ;;  %p569_p11 = scmp.lt.s32.totalorder %s567_s23, %s563_s12 }
  0x2d   : > { %197 = vrot.lane.b32.xlu0 %v192_v0, %s639_s28  ;;  %p565_p3 = pnand %p564_p1, %p726_p4  ;;  %p570_p12 = por %p569_p11, %p568_p10 }
  0x2f   : > { %p566_p9 = pneg %p565_p3 }
  0x31   : > { %p571_p13 = pnand %p570_p12, %p566_p9 }
  0x97   : > { %v254_v3 = vpop.permute.xlu0 %253 }
  0x98   : > { %404 = vmatpush.msk.msra.mxu2 %vm203_vm0, %v254_v3 }
  0x99   : > { %405 = vmatmul.msk.f32.vlgmr.msra.gmra.mxu2 %vm199_vm1, %v252_v2 }
  0x9f   : > { %v198_v5 = vpop.permute.xlu0 %197 }
  0xa0   : > { %400 = vmatpush.msk.msra.mxu0 %vm203_vm0, %v198_v5 }
  0xa1   : > { %401 = vmatmul.msk.f32.vlgmr.msra.gmra.mxu0 %vm199_vm1, %v195_v4 }
  0xa4   : > { %v248_v6 = vpop.f32.mrf.mxu1 }
 0x11c   : > { %v277_v8 = vpop.f32.mrf.mxu2 }
 0x11e   : > { %v223_v7 = vpop.f32.mrf.mxu0 }
 0x11f   : > { %v249_v9 = vadd.f32 %v248_v6, %v223_v7 }
 0x121   : > { %v280_v10 = vadd.f32 %v277_v8, %v249_v9 }
 0x123   : > { %282 = vst.msk [vmem:[%s191_s8] sm:$0xf] %vm281_vm2, %v280_v10 }
 0x124   : > { %574 = shalt.err (!%p571_p13)
}
 0x125   : > { %416 = dma.vmem_to_hbm [thread:$0]  (%p726_p4), %s298_s17, 64, %s300_s18, %s284_s15  }
 0x126 PF: > { %s311_s24 = sand.u32 1, %s613_s9   ;;  %p427_p0 = pnand %p393_p6, %p734_p7 }
 0x127   : > { %s312_s30 = scalar_lea.sflag [#allocation4], %s311_s24 }
 0x128   : > { %p428_p2 = pneg %p427_p0 }
 0x12a   : > { %608 = dma.done.wait (%p428_p2), %s312_s30, 64  }
 0x12b   : > { %610 = vsyncadd (%p428_p2), %s312_s30, 4294967232  ;;  %s19_s14 = sadd.s32 1, %s633_s14   ;;  %s807_s9 = smov %s617_s10 }
 0x12c   : > { %p16_p5 = scmp.ge.s32.totalorder %s19_s14, 4   ;;  %s808_s10 = smov %s621_s11 }
 0x12d   : > { %s809_s11 = smov %s732_s4  ;;  %s810_s12 = smov %s629_s13 }
 0x12e   : > { %s811_s13 = smov %s813_s26  ;;  %18 = sbr.rel (!%p16_p5) target bundleno = 7 (0x7), region = 79 }
 0x133   :  { %318 = vsyncpa [#allocation3], 1 }
 0x134   :  { %320 = vsyncpa [#allocation3 + $0x1], 1 }
 0x135   :  { %321 = vsyncpa [#allocation6], 1 }
 0x136   :  { %322 = vsyncpa [#allocation4], 1 }
 0x137   :  { %324 = vsyncpa [#allocation4 + $0x1], 1 }

</bundles_post_ra>
